<compile_context>
chip_gen: v7x
topology: tpu7x:2x2x1
jax: 0.10.0
libtpu: 0.0.40
codegen_flags: <defaults>
</compile_context>

<pallas_src>
import jax
import jax.numpy as jnp
import numpy as np
from jax.experimental import pallas as pl
from jax.experimental.pallas import tpu as pltpu

LANE = 128  # lane width: all packed blocks use 128-lane slabs


def _make_grnssm_kernel(n_extra: int):
    """n_extra = number of (hidden_dim -> hidden_dim) layers = n_hid_layers - 1."""

    def kernel(xu_ref, w1_ref, wrest_ref, out_ref):
        xu = xu_ref[...]                                   # (batch, nx+nu+1)

        # Single fused MXU push:
        #   lin[:, 0:128]   = [x@A^T + u@B^T + b_f | x@C^T | 0...]
        #   lin[:, 128:256] = [x@Wfx^T + u@Wfu^T + b_fu | 0...]
        lin = jnp.dot(xu, w1_ref[...], preferred_element_type=jnp.float32)

        head = lin[:, :LANE]                               # vreg-aligned slice
        fx = jnp.tanh(lin[:, LANE:2 * LANE])               # padded cols: tanh(0)=0

        for k in range(n_extra):                           # static unroll
            w = wrest_ref[k * LANE:(k + 1) * LANE, :]      # (128, 128) zero-padded W_hid^T
            fx = jnp.tanh(jnp.dot(fx, w, preferred_element_type=jnp.float32))

        w_out = wrest_ref[n_extra * LANE:(n_extra + 1) * LANE, :]  # zero-padded Wf^T
        out = head + jnp.dot(fx, w_out, preferred_element_type=jnp.float32)

        # One unmasked lane-dense (batch, 128) store; dx/y are sliced outside.
        out_ref[...] = out.astype(out_ref.dtype)

    return kernel


def pack_grnssm_params(params, n_hid_layers: int, dtype=jnp.float32):
    """Pack torch-layout weights into two VMEM-friendly buffers.  Run ONCE."""
    nx = params["A"].shape[0]
    nu = params["B"].shape[1]
    ny = params["C"].shape[0]
    hid = params["Wfx"].shape[0]
    n_extra = max(0, n_hid_layers - 1)
    assert nx + ny <= LANE and hid <= LANE, "pack layout assumes dims <= 128"

    # --- W1: (nx+nu+1, 256); LHS layout is [x | u | 1] ---
    w1 = jnp.zeros((nx + nu + 1, 2 * LANE), dtype)
    # first 128-lane half: x_lin (+ folded b_f) and y_lin blocks
    w1 = w1.at[0:nx, 0:nx].set(params["A"].T.astype(dtype))
    w1 = w1.at[nx:nx + nu, 0:nx].set(params["B"].T.astype(dtype))
    w1 = w1.at[nx + nu, 0:nx].set(params["b_f"].astype(dtype))
    w1 = w1.at[0:nx, nx:nx + ny].set(params["C"].T.astype(dtype))
    # second 128-lane half: fx pre-activation (+ folded b_fu)
    w1 = w1.at[0:nx, LANE:LANE + hid].set(params["Wfx"].T.astype(dtype))
    w1 = w1.at[nx:nx + nu, LANE:LANE + hid].set(params["Wfu"].T.astype(dtype))
    w1 = w1.at[nx + nu, LANE:LANE + hid].set(params["b_fu"].astype(dtype))

    # --- W_rest: stacked (128,128) blocks: hidden layers then Wf (one DMA) ---
    blocks = []
    for k in range(n_extra):
        blk = jnp.zeros((LANE, LANE), dtype).at[0:hid, 0:hid].set(
            params[f"W_hid{k}"].T.astype(dtype))
        blocks.append(blk)
    w_out = jnp.zeros((LANE, LANE), dtype).at[0:hid, 0:nx].set(
        params["Wf"].T.astype(dtype))
    blocks.append(w_out)
    w_rest = jnp.concatenate(blocks, axis=0)

    return {"w1": w1, "w_rest": w_rest, "nx": nx, "nu": nu, "ny": ny,
            "hid": hid, "n_extra": n_extra, "dtype": dtype}


def grnssm_forward(u, x, packed):
    batch = u.shape[0]
    nx, ny, n_extra = packed["nx"], packed["ny"], packed["n_extra"]
    dtype = packed["dtype"]

    # per-call packed LHS: [x | u | 1]  (single cheap concat)
    xu = jnp.concatenate(
        [x.astype(dtype), u.astype(dtype), jnp.ones((batch, 1), dtype)], axis=1)

    inputs = (xu, packed["w1"], packed["w_rest"])

    def full_spec(a):
        nd = a.ndim
        return pl.BlockSpec(a.shape, lambda i, _n=nd: (0,) * _n)

    out = pl.pallas_call(
        _make_grnssm_kernel(n_extra),
        grid=(1,),
        in_specs=[full_spec(a) for a in inputs],
        out_specs=pl.BlockSpec((batch, LANE), lambda i: (0, 0)),
        out_shape=jax.ShapeDtypeStruct((batch, LANE), jnp.float32),
        compiler_params=pltpu.CompilerParams(
            dimension_semantics=("arbitrary",)),
    )(*inputs)

    dx = out[:, :nx]
    y = out[:, nx:nx + ny]
    return dx, y


def grnssm_reference(u, x, params, n_hid_layers: int):
    x_lin = x @ params["A"].T + u @ params["B"].T
    y_lin = x @ params["C"].T
    fx = x @ params["Wfx"].T + u @ params["Wfu"].T + params["b_fu"]
    fx = jnp.tanh(fx)
    for k in range(max(0, n_hid_layers - 1)):
        fx = jnp.tanh(fx @ params[f"W_hid{k}"].T)
    fx = fx @ params["Wf"].T + params["b_f"]
    return x_lin + fx, y_lin


def init_params(key, input_dim, hidden_dim, state_dim, output_dim, n_hid_layers):
    """Deterministic synthetic init (torch nn.Linear weight layout: (out, in))."""
    keys = jax.random.split(key, 8 + max(0, n_hid_layers - 1))

    def w(k, out_d, in_d):
        bound = 1.0 / np.sqrt(in_d)
        return jax.random.uniform(k, (out_d, in_d), jnp.float32, -bound, bound)

    params = {
        "A": w(keys[0], state_dim, state_dim),
        "B": w(keys[1], state_dim, input_dim),
        "C": w(keys[2], output_dim, state_dim),
        "Wfx": w(keys[3], hidden_dim, state_dim),
        "Wfu": w(keys[4], hidden_dim, input_dim),
        "b_fu": jax.random.uniform(keys[5], (hidden_dim,), jnp.float32, -0.1, 0.1),
        "Wf": w(keys[6], state_dim, hidden_dim),
        "b_f": jax.random.uniform(keys[7], (state_dim,), jnp.float32, -0.1, 0.1),
    }
    for k in range(max(0, n_hid_layers - 1)):
        params[f"W_hid{k}"] = w(keys[8 + k], hidden_dim, hidden_dim)
    return params


if __name__ == "__main__":
    input_dim, hidden_dim, state_dim, output_dim = 4, 32, 16, 4
    n_hid_layers = 2
    batch = 8

    key = jax.random.PRNGKey(0)
    k_u, k_x, k_p = jax.random.split(key, 3)
    u = jax.random.normal(k_u, (batch, input_dim), jnp.float32)
    x = jax.random.normal(k_x, (batch, state_dim), jnp.float32)
    params = init_params(k_p, input_dim, hidden_dim, state_dim, output_dim,
                         n_hid_layers)

    # one-time packing (hoisted out of the hot path)
    packed = pack_grnssm_params(params, n_hid_layers, dtype=jnp.float32)

    dx, y = grnssm_forward(u, x, packed)
    jax.block_until_ready((dx, y))

    dx_ref, y_ref = grnssm_reference(u, x, params, n_hid_layers)
    np.testing.assert_allclose(np.asarray(dx), np.asarray(dx_ref), rtol=1e-5, atol=1e-5)
    np.testing.assert_allclose(np.asarray(y), np.asarray(y_ref), rtol=1e-5, atol=1e-5)

    print("KERNEL_OK")
</pallas_src>

<mosaic_0001>
module attributes {stable_mosaic.version = 11 : i64} {
  func.func @kernel(%arg0: i32, %arg1: memref<8x21xf32, #tpu.memory_space<vmem>>, %arg2: memref<21x256xf32, #tpu.memory_space<vmem>>, %arg3: memref<256x128xf32, #tpu.memory_space<vmem>>, %arg4: memref<8x128xf32, #tpu.memory_space<vmem>>) attributes {dimension_semantics = [#tpu.dimension_semantics<arbitrary>], iteration_bounds = array<i64: 1>, scalar_prefetch = 0 : i64, scratch_operands = 0 : i64, tpu.core_type = #tpu.core_type<tc>, window_params = [{pipeline_mode = #tpu.pipeline_mode<synchronous>, transform_indices = @transform_0, window_bounds = array<i64: 8, 21>}, {pipeline_mode = #tpu.pipeline_mode<synchronous>, transform_indices = @transform_1, window_bounds = array<i64: 21, 256>}, {pipeline_mode = #tpu.pipeline_mode<synchronous>, transform_indices = @transform_2, window_bounds = array<i64: 256, 128>}, {pipeline_mode = #tpu.pipeline_mode<synchronous>, transform_indices = @transform_3, window_bounds = array<i64: 8, 128>}]} {
    %c0 = arith.constant 0 : index
    %c0_0 = arith.constant 0 : index
    %0 = vector.load %arg1[%c0, %c0_0] : memref<8x21xf32, #tpu.memory_space<vmem>>, vector<8x21xf32>
    %c0_1 = arith.constant 0 : index
    %c0_2 = arith.constant 0 : index
    %1 = vector.load %arg2[%c0_1, %c0_2] : memref<21x256xf32, #tpu.memory_space<vmem>>, vector<21x256xf32>
    %cst = arith.constant dense<0.000000e+00> : vector<8x256xf32>
    %2 = tpu.matmul %0, %1, %cst {dimension_numbers = #tpu.dot_dimension_numbers<[1], [0], [0], [1], [0, 0, 1, 1], [], []>} : vector<8x21xf32>, vector<21x256xf32>, vector<8x256xf32> -> vector<8x256xf32>
    %3 = vector.extract_strided_slice %2 {offsets = [0, 0], sizes = [8, 128], strides = [1, 1]} : vector<8x256xf32> to vector<8x128xf32>
    %4 = vector.extract_strided_slice %2 {offsets = [0, 128], sizes = [8, 128], strides = [1, 1]} : vector<8x256xf32> to vector<8x128xf32>
    %5 = math.tanh %4 : vector<8x128xf32>
    %c0_3 = arith.constant 0 : index
    %c0_4 = arith.constant 0 : index
    %6 = vector.load %arg3[%c0_3, %c0_4] : memref<256x128xf32, #tpu.memory_space<vmem>>, vector<128x128xf32>
    %cst_5 = arith.constant dense<0.000000e+00> : vector<8x128xf32>
    %7 = tpu.matmul %5, %6, %cst_5 {dimension_numbers = #tpu.dot_dimension_numbers<[1], [0], [0], [1], [0, 0, 1, 1], [], []>} : vector<8x128xf32>, vector<128x128xf32>, vector<8x128xf32> -> vector<8x128xf32>
    %8 = math.tanh %7 : vector<8x128xf32>
    %c128 = arith.constant 128 : index
    %c0_6 = arith.constant 0 : index
    %9 = vector.load %arg3[%c128, %c0_6] : memref<256x128xf32, #tpu.memory_space<vmem>>, vector<128x128xf32>
    %cst_7 = arith.constant dense<0.000000e+00> : vector<8x128xf32>
    %10 = tpu.matmul %8, %9, %cst_7 {dimension_numbers = #tpu.dot_dimension_numbers<[1], [0], [0], [1], [0, 0, 1, 1], [], []>} : vector<8x128xf32>, vector<128x128xf32>, vector<8x128xf32> -> vector<8x128xf32>
    %11 = arith.addf %3, %10 : vector<8x128xf32>
    %c0_8 = arith.constant 0 : index
    %c0_9 = arith.constant 0 : index
    %12 = vector.load %arg4[%c0_8, %c0_9] : memref<8x128xf32, #tpu.memory_space<vmem>>, vector<8x128xf32>
    tpu.vector_store %arg4[%c0_8, %c0_9], %11 {strides = array<i32>} : memref<8x128xf32, #tpu.memory_space<vmem>>, vector<8x128xf32>,
    return
  }
  func.func @transform_0(%arg0: i32) -> (i32, i32) {
    %c0_i32 = arith.constant 0 : i32
    %c0_i32_0 = arith.constant 0 : i32
    %c0_i32_1 = arith.constant 0 : i32
    return %c0_i32, %c0_i32_0 : i32, i32
  }
  func.func @transform_1(%arg0: i32) -> (i32, i32) {
    %c0_i32 = arith.constant 0 : i32
    %c0_i32_0 = arith.constant 0 : i32
    %c0_i32_1 = arith.constant 0 : i32
    return %c0_i32, %c0_i32_0 : i32, i32
  }
  func.func @transform_2(%arg0: i32) -> (i32, i32) {
    %c0_i32 = arith.constant 0 : i32
    %c0_i32_0 = arith.constant 0 : i32
    %c0_i32_1 = arith.constant 0 : i32
    return %c0_i32, %c0_i32_0 : i32, i32
  }
  func.func @transform_3(%arg0: i32) -> (i32, i32) {
    %c0_i32 = arith.constant 0 : i32
    %c0_i32_0 = arith.constant 0 : i32
    %c0_i32_1 = arith.constant 0 : i32
    return %c0_i32, %c0_i32_0 : i32, i32
  }
}

</mosaic_0001>

<bundles_post_ra>
// kernel: tpu_custom_call.1
= control target key start
LH: loop header
LB: loop body
LE: loop exit
PB: predicated region body
PF: predicated region fallthrough
CT: control target
= control target key end

     0   :  { %8 = vsyncpa [#allocation3], 0  ;;  %s700_s0 = inlined_call_operand.hbm [shape: f32[8,21], index: 0, kind: input, shape index: {}]   ;;  %s701_s1 = inlined_call_operand.hbm [shape: f32[21,256], index: 1, kind: input, shape index: {}]   ;;  %s702_s2 = inlined_call_operand.hbm [shape: f32[256,128], index: 2, kind: input, shape index: {}]   ;;  %s703_s3 = inlined_call_operand.hbm [shape: f32[8,128], index: 3, kind: output, shape index: {}]  }
   0x1   :  { %9 = vsyncpa [#allocation6], 0 }
   0x2   :  { %10 = vsyncpa [#allocation4], 0  ;;  %s603_s12 = smov [#allocation5]   ;;  %s509_s16 = scalar_lea.hbm %s701_s1, 768 }
   0x3   :  { %s26_s13 = sshll.u32 %s603_s12, 4  ;;  %p510_p0 = scmp.ne.s32.totalorder %s701_s1, %s509_s16  ;;  %s27_s13 = int_to_ptr.vmem [resolvable:$true] %s26_s13 }
   0x4   :  { %p513_p1 = scmp.lt.u32.totalorder %s509_s16, %s701_s1 }
   0x6   :  { %p515_p2 = pnand %p513_p1, %p510_p0 }
   0x8   :  { %518 = shalt.err (!%p515_p2)
}
   0x9   :  { %s519_s21 = scalar_lea.vmem %s27_s13, 768  ;;  %p524_p4 = scmp.lt.s32.totalorder %s27_s13, %s27_s13 }
   0xa   :  { %p520_p3 = scmp.ne.s32.totalorder %s27_s13, %s519_s21  ;;  %p525_p5 = scmp.lt.s32.totalorder %s519_s21, %s519_s21 }
   0xc   :  { %p526_p6 = por %p525_p5, %p524_p4 }
   0xe   :  { %p527_p7 = pnand %p526_p6, %p520_p3 }
  0x10   :  { %530 = shalt.err (!%p527_p7)
}
  0x11   :  { %s604_s22 = smov 256   ;;  %s605_s23 = smov 16  }
  0x12   :  { %32 = dma.hbm_to_vmem [thread:$0]  %s701_s1, 768, %s27_s13, [#allocation6], %s604_s22, %s604_s22, %s605_s23  }
  0x13   :  { %s606_s26 = smov [#allocation2]   ;;  %s607_s28 = smov [#allocation7]  }
  0x14   :  { %s17_s27 = sshll.u32 %s606_s26, 4  ;;  %s38_s29 = sshll.u32 %s607_s28, 4  ;;  %s18_s27 = int_to_ptr.vmem [resolvable:$true] %s17_s27  ;;  %s39_s29 = int_to_ptr.vmem [resolvable:$true] %s38_s29 }
  0x15   :  { %s531_s5 = scalar_lea.hbm %s700_s0, 128 }
  0x16   :  { %p532_p8 = scmp.ne.s32.totalorder %s700_s0, %s531_s5  ;;  %p535_p9 = scmp.lt.u32.totalorder %s531_s5, %s700_s0 }
  0x18   :  { %p537_p10 = pnand %p535_p9, %p532_p8 }
  0x1a   :  { %540 = shalt.err (!%p537_p10)
}
  0x1b   :  { %s541_s1 = scalar_lea.vmem %s18_s27, 128  ;;  %p546_p12 = scmp.lt.s32.totalorder %s18_s27, %s18_s27 }
  0x1c   :  { %p542_p11 = scmp.ne.s32.totalorder %s18_s27, %s541_s1  ;;  %p547_p13 = scmp.lt.s32.totalorder %s541_s1, %s541_s1 }
  0x1e   :  { %p548_p0 = por %p547_p13, %p546_p12 }
  0x20   :  { %p549_p1 = pnand %p548_p0, %p542_p11 }
  0x22   :  { %552 = shalt.err (!%p549_p1)
}
  0x23   :  { %20 = dma.hbm_to_vmem [thread:$0]  %s700_s0, 128, %s18_s27, [#allocation3]  }
  0x24   :  { %s553_s14 = scalar_lea.hbm %s702_s2, 4096 }
  0x25   :  { %p554_p2 = scmp.ne.s32.totalorder %s702_s2, %s553_s14  ;;  %p557_p3 = scmp.lt.u32.totalorder %s553_s14, %s702_s2 }
  0x27   :  { %p559_p4 = pnand %p557_p3, %p554_p2 }
  0x29   :  { %562 = shalt.err (!%p559_p4)
}
  0x2a   :  { %s563_s19 = scalar_lea.vmem %s39_s29, 4096  ;;  %p568_p6 = scmp.lt.s32.totalorder %s39_s29, %s39_s29 }
  0x2b   :  { %p564_p5 = scmp.ne.s32.totalorder %s39_s29, %s563_s19  ;;  %p569_p7 = scmp.lt.s32.totalorder %s563_s19, %s563_s19 }
  0x2d   :  { %p570_p8 = por %p569_p7, %p568_p6 }
  0x2f   :  { %p571_p9 = pnand %p570_p8, %p564_p5 }
  0x31   :  { %574 = shalt.err (!%p571_p9)
}
  0x32   :  { %s608_s0 = smov 128   ;;  %s609_s20 = smov 8  }
  0x33   :  { %44 = dma.hbm_to_vmem [thread:$0]  %s702_s2, 4096, %s39_s29, [#allocation6], %s608_s0, %s608_s0, %s609_s20  }
  0x34   :  { %597 = dma.done.wait [#allocation3], 128  }
  0x35   :  { %598 = vsyncadd [#allocation3], 4294967168 }
  0x36   :  { %599 = dma.done.wait [#allocation6], 4864  }
  0x37   :  { %600 = vsyncadd [#allocation6], 4294962432  ;;  %v610_v0 = vmov 0.0   ;;  %v611_v1 = vmov 0.0|0.0   ;;  %v56_v2 = vld [vmem:[#allocation5 + $0x8] sm:$0xff]  ;;  %v58_v3 = vld [vmem:[#allocation5 + $0x18] sm:$0xff] }
  0x38   :  { %136 = vmatprep.mubr.f32.mxu0 %v610_v0  ;;  %446 = vmatprep.subr.bf16.mxu1 %v611_v1  ;;  %v55_v4 = vld [vmem:[#allocation5] sm:$0xff]  ;;  %v442_v5 = vpack.c.bf16 %v58_v3, %v56_v2  ;;  %v57_v6 = vld [vmem:[#allocation5 + $0x10] sm:$0xff]  ;;  %v60_v8 = vld [vmem:[#allocation5 + $0x28] sm:$0x1f]  ;;  %vm65_vm0 = vcmask 1044480   ;;  %vm61_vm1 = vcmask 171008  }
  0x39   :  { %v444_v7 = vpack.c.bf16 %v57_v6, %v55_v4  ;;  %v144_v9 = vld [vmem:[#allocation7] sm:$0xff]  ;;  %v145_v10 = vld [vmem:[#allocation7 + $0x8] sm:$0xff]  ;;  %v146_v12 = vld [vmem:[#allocation7 + $0x10] sm:$0xff]  ;;  %vm612_vm2 = vmmov 0   ;;  %s613_s2 = smov [#allocation8]  }
  0x3a   :  { %443 = vmatprep.subr.bf16.mxu0 %v442_v5  ;;  %v447_v11 = vpack.c.bf16 %v145_v10, %v144_v9  ;;  %v147_v13 = vld [vmem:[#allocation7 + $0x18] sm:$0xff]  ;;  %v59_v14 = vld [vmem:[#allocation5 + $0x20] sm:$0x1f]  ;;  %v54_v16 = vld [vmem:[#allocation2] sm:$0xff]  ;;  %404 = vmatprep.mubr.msk.f32.mxu1 %vm612_vm2, %v610_v0  ;;  %s325_s23 = sshll.u32 %s613_s2, 4  ;;  %s326_s23 = int_to_ptr.vmem [resolvable:$true] %s325_s23 }
  0x3b   :  { %445 = vmatpush1.bf16.msra.mxu0 %v444_v7  ;;  %v450_v15 = vpack.c.bf16 %v147_v13, %v146_v12  ;;  %v148_v17 = vld [vmem:[#allocation7 + $0x20] sm:$0xff]  ;;  %v149_v18 = vld [vmem:[#allocation7 + $0x28] sm:$0xff]  ;;  %v150_v20 = vld [vmem:[#allocation7 + $0x30] sm:$0xff]  ;;  %s575_s24 = scalar_lea.vmem %s326_s23, 128  ;;  %p580_p11 = scmp.lt.s32.totalorder %s326_s23, %s326_s23 }
  0x3c   :  { %335 = vmatprep.subr.msk.mxu0 %vm65_vm0, %v60_v8  ;;  %448 = vmatpush3.bf16.msra.mxu1 %v447_v11  ;;  %v453_v19 = vpack.c.bf16 %v149_v18, %v148_v17  ;;  %v151_v21 = vld [vmem:[#allocation7 + $0x38] sm:$0xff]  ;;  %v152_v23 = vld [vmem:[#allocation7 + $0x40] sm:$0xff]  ;;  %v153_v24 = vld [vmem:[#allocation7 + $0x48] sm:$0xff]  ;;  %p576_p10 = scmp.ne.s32.totalorder %s326_s23, %s575_s24  ;;  %p581_p12 = scmp.lt.s32.totalorder %s575_s24, %s575_s24 }
  0x3d   :  { %449 = vmatprep.subr.bf16.mxu1 %v611_v1  ;;  %v456_v22 = vpack.c.bf16 %v151_v21, %v150_v20  ;;  %v459_v25 = vpack.c.bf16 %v153_v24, %v152_v23  ;;  %v154_v26 = vld [vmem:[#allocation7 + $0x50] sm:$0xff]  ;;  %v155_v27 = vld [vmem:[#allocation7 + $0x58] sm:$0xff]  ;;  %v156_v29 = vld [vmem:[#allocation7 + $0x60] sm:$0xff] }
  0x3e   :  { %v462_v28 = vpack.c.bf16 %v155_v27, %v154_v26  ;;  %v157_v30 = vld [vmem:[#allocation7 + $0x68] sm:$0xff]  ;;  %v158_v32 = vld [vmem:[#allocation7 + $0x70] sm:$0xff]  ;;  %v159_v33 = vld [vmem:[#allocation7 + $0x78] sm:$0xff]  ;;  %p582_p13 = por %p581_p12, %p580_p11 }
  0x3f   :  { %336 = vmatpush1.msk.msra.mxu0 %vm65_vm0, %v59_v14  ;;  %v465_v31 = vpack.c.bf16 %v157_v30, %v156_v29  ;;  %v468_v34 = vpack.c.bf16 %v159_v33, %v158_v32  ;;  %v231_v35 = vld [vmem:[#allocation7 + $0x80] sm:$0xff]  ;;  %v232_v36 = vld [vmem:[#allocation7 + $0x88] sm:$0xff]  ;;  %v233_v37 = vld [vmem:[#allocation7 + $0x90] sm:$0xff] }
  0x40   :  { %337 = vmatmul.mubr.msk.f32.vlgmr.msra.gmra.mrb[0].mxu0 %vm61_vm1, %v54_v16  ;;  %451 = vmatpush3.bf16.msra.mxu1 %v450_v15  ;;  %v471_v38 = vpack.c.bf16 %v232_v36, %v231_v35  ;;  %v234_v39 = vld [vmem:[#allocation7 + $0x98] sm:$0xff]  ;;  %v235_v41 = vld [vmem:[#allocation7 + $0xa0] sm:$0xff]  ;;  %v236_v42 = vld [vmem:[#allocation7 + $0xa8] sm:$0xff]  ;;  %p583_p0 = pnand %p582_p13, %p576_p10 }
  0x41   :  { %452 = vmatprep.subr.bf16.mxu1 %v611_v1  ;;  %470 = vmatprep.subr.bf16.mxu0 %v611_v1  ;;  %v474_v40 = vpack.c.bf16 %v234_v39, %v233_v37  ;;  %v477_v43 = vpack.c.bf16 %v236_v42, %v235_v41  ;;  %v237_v44 = vld [vmem:[#allocation7 + $0xb0] sm:$0xff]  ;;  %v238_v45 = vld [vmem:[#allocation7 + $0xb8] sm:$0xff]  ;;  %v239_v47 = vld [vmem:[#allocation7 + $0xc0] sm:$0xff] }
  0x42   :  { %439 = vmatprep.mubr.msk.f32.mxu0 %vm612_vm2, %v610_v0  ;;  %472 = vmatpush3.bf16.msra.mxu0 %v471_v38  ;;  %v480_v46 = vpack.c.bf16 %v238_v45, %v237_v44  ;;  %v240_v48 = vld [vmem:[#allocation7 + $0xc8] sm:$0xff]  ;;  %v241_v53 = vld [vmem:[#allocation7 + $0xd0] sm:$0xff]  ;;  %v242_v54 = vld [vmem:[#allocation7 + $0xd8] sm:$0xff] }
  0x43   :  { %473 = vmatprep.subr.bf16.mxu0 %v611_v1  ;;  %v483_v49 = vpack.c.bf16 %v240_v48, %v239_v47  ;;  %v486_v55 = vpack.c.bf16 %v242_v54, %v241_v53  ;;  %v243_v56 = vld [vmem:[#allocation7 + $0xe0] sm:$0xff]  ;;  %v244_v57 = vld [vmem:[#allocation7 + $0xe8] sm:$0xff]  ;;  %v245_v59 = vld [vmem:[#allocation7 + $0xf0] sm:$0xff] }
  0x44   :  { %454 = vmatpush3.bf16.msra.mxu1 %v453_v19  ;;  %v489_v58 = vpack.c.bf16 %v244_v57, %v243_v56  ;;  %v246_v60 = vld [vmem:[#allocation7 + $0xf8] sm:$0xff] }
  0x45   :  { %455 = vmatprep.subr.bf16.mxu1 %v611_v1  ;;  %v492_v61 = vpack.c.bf16 %v246_v60, %v245_v59 }
  0x46   :  { %475 = vmatpush3.bf16.msra.mxu0 %v474_v40 }
  0x47   :  { %476 = vmatprep.subr.bf16.mxu0 %v611_v1 }
  0x48   :  { %457 = vmatpush3.bf16.msra.mxu1 %v456_v22 }
  0x49   :  { %458 = vmatprep.subr.bf16.mxu1 %v611_v1 }
  0x4a   :  { %478 = vmatpush3.bf16.msra.mxu0 %v477_v43 }
  0x4b   :  { %479 = vmatprep.subr.bf16.mxu0 %v611_v1 }
  0x4c   :  { %460 = vmatpush3.bf16.msra.mxu1 %v459_v25 }
  0x4d   :  { %461 = vmatprep.subr.bf16.mxu1 %v611_v1 }
  0x4e   :  { %481 = vmatpush3.bf16.msra.mxu0 %v480_v46 }
  0x4f   :  { %482 = vmatprep.subr.bf16.mxu0 %v611_v1 }
  0x50   :  { %463 = vmatpush3.bf16.msra.mxu1 %v462_v28 }
  0x51   :  { %464 = vmatprep.subr.bf16.mxu1 %v611_v1 }
  0x52   :  { %484 = vmatpush3.bf16.msra.mxu0 %v483_v49 }
  0x53   :  { %485 = vmatprep.subr.bf16.mxu0 %v611_v1 }
  0x54   :  { %466 = vmatpush3.bf16.msra.mxu1 %v465_v31 }
  0x55   :  { %467 = vmatprep.subr.bf16.mxu1 %v611_v1 }
  0x56   :  { %487 = vmatpush3.bf16.msra.mxu0 %v486_v55 }
  0x57   :  { %488 = vmatprep.subr.bf16.mxu0 %v611_v1 }
  0x58   :  { %469 = vmatpush3.bf16.msra.mxu1 %v468_v34 }
  0x5a   :  { %490 = vmatpush3.bf16.msra.mxu0 %v489_v58 }
  0x5b   :  { %491 = vmatprep.subr.bf16.mxu0 %v611_v1 }
  0x5e   :  { %493 = vmatpush3.bf16.msra.mxu0 %v492_v61 }
 0x113   :  { %v138_v50 = vpop.f32.mrb[0].mxu0 }
 0x114   :  { %v140_v51 = vpop.f32.mrb[1].mxu0 }
 0x115   :  { %505 = vtanh.f32 %v140_v51 }
 0x11f   :  { %v506_v52 = vpop.eup %505 }
 0x120   :  { %405 = vmatmul.mubr.f32.vlgmr.msra.gmra.mrb[0].mxu1 %v506_v52 }
 0x1f3   :  { %v226_v62 = vpop.f32.mrb[0].mxu1 }
 0x1f4   :  { %507 = vtanh.f32 %v226_v62  ;;  %v406_v63 = vpop.f32.mrb[1].mxu1 }
 0x1fe   :  { %v508_v0 = vpop.eup %507 }
 0x1ff   :  { %440 = vmatmul.mubr.f32.vlgmr.msra.gmra.mrb[2].mxu0 %v508_v0 }
 0x2d2   :  { %v313_v2 = vpop.f32.mrb[2].mxu0 }
 0x2d3   :  { %v317_v3 = vadd.f32 %v313_v2, %v138_v50  ;;  %v441_v4 = vpop.f32.mrb[3].mxu0 }
 0x2d5   :  { %318 = vst [vmem:[#allocation8] sm:$0xff] %v317_v3 }
 0x2d6   :  { %586 = shalt.err (!%p583_p0)
}
 0x2d7   :  { %s587_s27 = scalar_lea.hbm %s703_s3, 128 }
 0x2d8   :  { %p588_p1 = scmp.ne.s32.totalorder %s703_s3, %s587_s27  ;;  %p591_p2 = scmp.lt.u32.totalorder %s587_s27, %s703_s3 }
 0x2da   :  { %p593_p3 = pnand %p591_p2, %p588_p1 }
 0x2dc   :  { %596 = shalt.err (!%p593_p3)
}
 0x2dd   :  { %328 = dma.vmem_to_hbm [thread:$0]  %s326_s23, 128, %s703_s3, [#allocation4]  }
 0x2de   :  { %601 = dma.done.wait [#allocation4], 128  }
 0x2df   :  { %602 = vsyncadd [#allocation4], 4294967168 }
 0x2e0   :  { %332 = vsyncpa [#allocation3], 1 }
 0x2e1   :  { %333 = vsyncpa [#allocation6], 1 }
 0x2e2   :  { %334 = vsyncpa [#allocation4], 1 }

</bundles_post_ra>
